<compile_context>
chip_gen: v7x
topology: tpu7x:2x2x1
jax: 0.10.0
libtpu: 0.0.40
codegen_flags: <defaults>
</compile_context>

<pallas_src>
import math
import functools

import jax
import jax.numpy as jnp
from jax import lax
from jax.experimental import pallas as pl
from jax.experimental.pallas import tpu as pltpu


def _attn_kernel(h_ref, wqT_ref, bq_ref, wk_ref, bk_ref, out_ref,
                 kscr_ref, sscr_ref, m_ref, l_ref, *,
                 num_heads, head_dim, q_tile, k_tile, seq_len, context_window,
                 compute_dtype):
    # h_ref   : (1, Sp, D)   hidden states (full padded sequence, one batch)
    # wqT_ref : (D, A)       fused query weight (pre-transposed), compute dtype
    # bq_ref  : (1, A)       query bias (f32)
    # wk_ref  : (H, d, D)    per-head key weight (PyTorch layout reshaped), compute dtype
    # bk_ref  : (H, d, 1)    per-head key bias (f32)
    # out_ref : (1, TQ, Sp)  attention probabilities for this query tile
    # kscr_ref: (H, d, Sp)   persistent K^T scratch (filled once per batch at qi == 0)
    # sscr_ref: (TQ, Sp)     pooled masked scores (band tiles only)
    # m_ref   : (TQ, 1)      running row max   (online softmax)
    # l_ref   : (TQ, 1)      running row sum   (online softmax)
    qi = pl.program_id(1)
    Sp = h_ref.shape[1]
    H, d, w = num_heads, head_dim, context_window
    TQ, TK = q_tile, k_tile
    n_kt = Sp // TK
    scale = 1.0 / math.sqrt(d)

    # ---- project K^T for the whole sequence once per batch -------------------
    # (q-tile grid axis is "arbitrary" => iterates sequentially per batch)
    @pl.when(qi == 0)
    def _fill_k():
        h_full = h_ref[0]                                             # [Sp, D]
        for h in range(H):                                            # static, unrolled
            # K_h^T = W_k,h @ hidden^T  (A.B^T form; no in-kernel transposes)
            khT = lax.dot_general(wk_ref[h], h_full,
                                  (((1,), (1,)), ((), ())),
                                  preferred_element_type=jnp.float32)  # [d, Sp]
            khT = khT + bk_ref[h]                                      # + [d, 1]
            kscr_ref[h] = khT.astype(kscr_ref.dtype)

    # ---- fused Q projection for this query tile (N = all_head_size fills MXU) -
    r0 = pl.multiple_of(qi * TQ, TQ)
    h_q = h_ref[0, pl.ds(r0, TQ), :]                                   # [TQ, D]
    q_all = jnp.dot(h_q, wqT_ref[...], preferred_element_type=jnp.float32)
    q_all = (q_all + bq_ref[...]) * scale          # fold 1/sqrt(d) into Q (max/softmax safe)
    q_heads = [q_all[:, h * d:(h + 1) * d].astype(compute_dtype) for h in range(H)]

    # ---- online-softmax statistics -------------------------------------------
    m_ref[...] = jnp.full((TQ, 1), -1e30, dtype=jnp.float32)
    l_ref[...] = jnp.zeros((TQ, 1), dtype=jnp.float32)

    rows = r0 + lax.broadcasted_iota(jnp.int32, (TQ, TK), 0)

    def tile_overlaps_band(c0):
        # does key tile [c0, c0+TK) overlap the band of query rows [r0, r0+TQ)?
        return jnp.logical_and(c0 <= r0 + (TQ - 1) + w,
                               c0 + (TK - 1) >= r0 - w)

    # ---- pass 1: in-band key tiles -> pooled scores + running max/sum --------
    for t in range(n_kt):                       # static column offsets, unrolled
        c0 = t * TK

        @pl.when(tile_overlaps_band(c0))
        def _pass1(c0=c0):
            pooled = None
            for h in range(H):                  # head-inner: accumulator stays in vregs
                kh = kscr_ref[h, :, c0:c0 + TK]                       # [d, TK]
                s = jnp.dot(q_heads[h], kh,
                            preferred_element_type=jnp.float32)       # [TQ, TK]
                pooled = s if pooled is None else jnp.maximum(pooled, s)
            cols = c0 + lax.broadcasted_iota(jnp.int32, (TQ, TK), 1)
            in_band = jnp.logical_and(jnp.abs(rows - cols) <= w, cols < seq_len)
            pooled = pooled + jnp.where(in_band, 0.0, -10000.0)
            sscr_ref[:, c0:c0 + TK] = pooled
            m_prev = m_ref[...]
            m_new = jnp.maximum(m_prev, jnp.max(pooled, axis=-1, keepdims=True))
            l_ref[...] = (l_ref[...] * jnp.exp(m_prev - m_new)
                          + jnp.sum(jnp.exp(pooled - m_new), axis=-1, keepdims=True))
            m_ref[...] = m_new

    # ---- pass 2: normalize band tiles, exact zeros everywhere else -----------
    m = m_ref[...]
    inv_l = pl.reciprocal(l_ref[...])           # EXACT reciprocal: rows sum to 1
    for t in range(n_kt):
        c0 = t * TK
        on = tile_overlaps_band(c0)

        @pl.when(on)
        def _write_band(c0=c0):
            probs = jnp.exp(sscr_ref[:, c0:c0 + TK] - m) * inv_l
            out_ref[0, :, c0:c0 + TK] = probs.astype(out_ref.dtype)

        @pl.when(jnp.logical_not(on))
        def _write_zeros(c0=c0):
            out_ref[0, :, c0:c0 + TK] = jnp.zeros((TQ, TK), dtype=out_ref.dtype)


def sliding_window_attention_probs(hidden, wq, bq, wk, bk, *, num_heads,
                                   context_window,
                                   compute_dtype=jnp.bfloat16,
                                   out_dtype=jnp.bfloat16,
                                   q_tile=None):
    """hidden: [B, S, D]; wq/wk: [A, D] (PyTorch Linear layout); bq/bk: [A].

    Returns attention_probs [B, S, S] (the module's second output; the first,
    context_layer, is None on the use_value=False path).
    out_dtype defaults to bf16 (halves the dominant HBM writeback); pass
    jnp.float32 for exact-match comparisons."""
    B, S, D = hidden.shape
    A = wq.shape[0]
    assert wq.shape == (A, D) and wk.shape == (A, D)
    assert bq.shape == (A,) and bk.shape == (A,)
    assert A % num_heads == 0
    d = A // num_heads
    w = int(context_window)

    # Tile policy: 256-row tiles fill the 2x256x256 MXU on v6e/v7x, 128 otherwise;
    # short sequences use a single tile padded to a sublane multiple.  Ragged S is
    # always padded (never a silent full-S fallback).
    if q_tile is None:
        if S >= 1024:
            q_tile = 256
        elif S > 512:
            q_tile = 128
        else:
            q_tile = ((S + 7) // 8) * 8
    Sp = ((S + q_tile - 1) // q_tile) * q_tile
    k_tile = q_tile

    hidden_p = hidden
    if Sp != S:
        hidden_p = jnp.pad(hidden, ((0, 0), (0, Sp - S), (0, 0)))
    hidden_c = hidden_p.astype(compute_dtype)

    # Lane-dense host-side layouts: no in-kernel transposes anywhere.
    wqT = jnp.transpose(wq).astype(compute_dtype)                 # [D, A]
    bq2 = bq.reshape(1, A).astype(jnp.float32)
    wk_h = wk.reshape(num_heads, d, D).astype(compute_dtype)      # [H, d, D]
    bk2 = bk.reshape(num_heads, d, 1).astype(jnp.float32)

    kernel = functools.partial(
        _attn_kernel, num_heads=num_heads, head_dim=d, q_tile=q_tile,
        k_tile=k_tile, seq_len=S, context_window=w, compute_dtype=compute_dtype)

    # Rough cost hint so XLA can schedule surrounding ops around this call.
    n_q = Sp // q_tile
    nb = min(Sp // k_tile, (q_tile + 2 * w) // k_tile + 2)        # band key tiles / q tile
    flops = (4 * B * Sp * D * A                                   # Q + K projections
             + 2 * B * num_heads * n_q * q_tile * nb * k_tile * d)
    transcendentals = 2 * B * n_q * q_tile * nb * k_tile
    bytes_accessed = (B * Sp * Sp * jnp.dtype(out_dtype).itemsize
                      + B * Sp * D * jnp.dtype(compute_dtype).itemsize
                      + 2 * D * A * jnp.dtype(compute_dtype).itemsize)

    out = pl.pallas_call(
        kernel,
        out_shape=jax.ShapeDtypeStruct((B, Sp, Sp), out_dtype),
        grid_spec=pltpu.PrefetchScalarGridSpec(
            num_scalar_prefetch=0,
            grid=(B, n_q),
            in_specs=[
                pl.BlockSpec((1, Sp, D), lambda b, qi: (b, 0, 0)),           # hidden
                pl.BlockSpec((D, A), lambda b, qi: (0, 0)),                  # Wq^T (resident)
                pl.BlockSpec((1, A), lambda b, qi: (0, 0)),                  # bq   (resident)
                pl.BlockSpec((num_heads, d, D), lambda b, qi: (0, 0, 0)),    # Wk   (resident)
                pl.BlockSpec((num_heads, d, 1), lambda b, qi: (0, 0, 0)),    # bk   (resident)
            ],
            out_specs=pl.BlockSpec((1, q_tile, Sp), lambda b, qi: (b, qi, 0)),
            scratch_shapes=[
                pltpu.VMEM((num_heads, d, Sp), compute_dtype),   # K^T cache (per batch)
                pltpu.VMEM((q_tile, Sp), jnp.float32),           # pooled band scores
                pltpu.VMEM((q_tile, 1), jnp.float32),            # online-softmax max
                pltpu.VMEM((q_tile, 1), jnp.float32),            # online-softmax sum
            ]),
        compiler_params=pltpu.CompilerParams(
            # q-tile axis must stay sequential ("arbitrary") so the per-batch K
            # scratch filled at qi==0 is valid; batch axis is megacore-parallel.
            dimension_semantics=("parallel", "arbitrary"),
            vmem_limit_bytes=48 * 1024 * 1024),
        cost_estimate=pl.CostEstimate(flops=int(flops),
                                      transcendentals=int(transcendentals),
                                      bytes_accessed=int(bytes_accessed)),
    )(hidden_c, wqT, bq2, wk_h, bk2)

    if Sp != S:
        out = out[:, :S, :S]
    return out


def _reference(hidden, wq, bq, wk, bk, *, num_heads, context_window):
    """Pure-JAX replica of SlidingWindowSelfAttenion.forward (default path)."""
    B, S, D = hidden.shape
    A = wq.shape[0]
    d = A // num_heads
    q = jnp.dot(hidden, wq.T, precision='highest') + bq
    k = jnp.dot(hidden, wk.T, precision='highest') + bk
    q = q.reshape(B, S, num_heads, d).transpose(0, 2, 1, 3)
    k = k.reshape(B, S, num_heads, d).transpose(0, 2, 1, 3)
    scores = jnp.einsum('bhqd,bhkd->bhqk', q, k, precision='highest') / math.sqrt(d)
    i = jnp.arange(S)[:, None]
    j = jnp.arange(S)[None, :]
    band = jnp.abs(i - j) <= context_window
    scores = scores + jnp.where(band, 0.0, -10000.0)[None, None]
    pooled = jnp.max(scores, axis=1)                               # max over heads
    return jax.nn.softmax(pooled, axis=-1)


if __name__ == "__main__":
    def make_inputs(key, B, S, D, A):
        k1, k2, k3, k4, k5 = jax.random.split(key, 5)
        hidden = jax.random.normal(k1, (B, S, D), dtype=jnp.float32)
        # PyTorch Linear layout: [out_features, in_features]
        wq = jax.random.normal(k2, (A, D), dtype=jnp.float32) * 0.1
        bq = jax.random.normal(k3, (A,), dtype=jnp.float32) * 0.1
        wk = jax.random.normal(k4, (A, D), dtype=jnp.float32) * 0.1
        bk = jax.random.normal(k5, (A,), dtype=jnp.float32) * 0.1
        return hidden, wq, bq, wk, bk

    root = jax.random.PRNGKey(0)
    key1, key2 = jax.random.split(root)

    # 1) Spec-scale check: B=2, S=8, hidden=32, 4 heads (single dense tile path).
    B, S, D, H, w = 2, 8, 32, 4, 3
    hidden, wq, bq, wk, bk = make_inputs(key1, B, S, D, D)
    out = sliding_window_attention_probs(hidden, wq, bq, wk, bk,
                                         num_heads=H, context_window=w,
                                         out_dtype=jnp.float32)
    out = jax.block_until_ready(out)
    ref = _reference(hidden, wq, bq, wk, bk, num_heads=H, context_window=w)
    assert out.shape == (B, S, S)
    # bf16 projection / QK^T operands (f32 accumulation) => relaxed value tolerance.
    assert jnp.allclose(out, ref, atol=1e-2, rtol=1e-2), "mismatch vs reference (small)"
    # exact reciprocal in the softmax => rows sum to 1
    assert jnp.allclose(jnp.sum(out, axis=-1), 1.0, atol=1e-3), "rows must sum to 1 (small)"

    # 2) Banded / padded path: S not a tile multiple, several key tiles, and
    #    out-of-band key tiles actually skipped.
    B2, S2, D2, H2, w2 = 1, 600, 32, 4, 48
    hidden2, wq2, bq2, wk2, bk2 = make_inputs(key2, B2, S2, D2, D2)
    out2 = sliding_window_attention_probs(hidden2, wq2, bq2, wk2, bk2,
                                          num_heads=H2, context_window=w2,
                                          out_dtype=jnp.float32)
    out2 = jax.block_until_ready(out2)
    ref2 = _reference(hidden2, wq2, bq2, wk2, bk2, num_heads=H2, context_window=w2)
    assert out2.shape == (B2, S2, S2)
    assert jnp.allclose(out2, ref2, atol=1e-2, rtol=1e-2), "mismatch vs reference (banded)"
    assert jnp.allclose(jnp.sum(out2, axis=-1), 1.0, atol=1e-3), "rows must sum to 1 (banded)"

    print("KERNEL_OK")
</pallas_src>

<mosaic_0001>
module attributes {stable_mosaic.version = 11 : i64} {
  func.func @_attn_kernel(%arg0: i32, %arg1: i32, %arg2: memref<1x8x32xbf16, #tpu.memory_space<vmem>>, %arg3: memref<32x32xbf16, #tpu.memory_space<vmem>>, %arg4: memref<1x32xf32, #tpu.memory_space<vmem>>, %arg5: memref<4x8x32xbf16, #tpu.memory_space<vmem>>, %arg6: memref<4x8x1xf32, #tpu.memory_space<vmem>>, %arg7: memref<1x8x8xf32, #tpu.memory_space<vmem>>, %arg8: memref<4x8x8xbf16, #tpu.memory_space<vmem>>, %arg9: memref<8x8xf32, #tpu.memory_space<vmem>>, %arg10: memref<8x1xf32, #tpu.memory_space<vmem>>, %arg11: memref<8x1xf32, #tpu.memory_space<vmem>>) attributes {dimension_semantics = [#tpu.dimension_semantics<parallel>, #tpu.dimension_semantics<arbitrary>], iteration_bounds = array<i64: 2, 1>, scalar_prefetch = 0 : i64, scratch_operands = 4 : i64, tpu.core_type = #tpu.core_type<tc>, window_params = [{transform_indices = @transform_0, window_bounds = array<i64: 1, 8, 32>}, {pipeline_mode = #tpu.pipeline_mode<synchronous>, transform_indices = @transform_1, window_bounds = array<i64: 32, 32>}, {pipeline_mode = #tpu.pipeline_mode<synchronous>, transform_indices = @transform_2, window_bounds = array<i64: 1, 32>}, {pipeline_mode = #tpu.pipeline_mode<synchronous>, transform_indices = @transform_3, window_bounds = array<i64: 4, 8, 32>}, {pipeline_mode = #tpu.pipeline_mode<synchronous>, transform_indices = @transform_4, window_bounds = array<i64: 4, 8, 1>}, {transform_indices = @transform_5, window_bounds = array<i64: 1, 8, 8>}]} {
    %c0_i32 = arith.constant 0 : i32
    %0 = arith.cmpi eq, %arg1, %c0_i32 : i32
    %1 = arith.extui %0 : i1 to i32
    %c0_i32_0 = arith.constant 0 : i32
    %2 = arith.cmpi ne, %1, %c0_i32_0 : i32
    scf.if %2 {
      %c0_28 = arith.constant 0 : index
      %c0_29 = arith.constant 0 : index
      %c0_30 = arith.constant 0 : index
      %52 = vector.load %arg2[%c0_28, %c0_29, %c0_30] : memref<1x8x32xbf16, #tpu.memory_space<vmem>>, vector<1x8x32xbf16>
      %53 = vector.shape_cast %52 : vector<1x8x32xbf16> to vector<8x32xbf16>
      %c0_31 = arith.constant 0 : index
      %c0_32 = arith.constant 0 : index
      %c0_33 = arith.constant 0 : index
      %54 = vector.load %arg5[%c0_31, %c0_32, %c0_33] : memref<4x8x32xbf16, #tpu.memory_space<vmem>>, vector<1x8x32xbf16>
      %55 = vector.shape_cast %54 : vector<1x8x32xbf16> to vector<8x32xbf16>
      %cst_34 = arith.constant dense<0.000000e+00> : vector<8x8xf32>
      %56 = tpu.matmul %55, %53, %cst_34 {dimension_numbers = #tpu.dot_dimension_numbers<[1], [1], [0], [0], [0, 0, 1, 0], [], []>} : vector<8x32xbf16>, vector<8x32xbf16>, vector<8x8xf32> -> vector<8x8xf32>
      %c0_35 = arith.constant 0 : index
      %c0_36 = arith.constant 0 : index
      %c0_37 = arith.constant 0 : index
      %57 = vector.load %arg6[%c0_35, %c0_36, %c0_37] : memref<4x8x1xf32, #tpu.memory_space<vmem>>, vector<1x8x1xf32>
      %58 = vector.shape_cast %57 : vector<1x8x1xf32> to vector<8x1xf32>
      %59 = vector.broadcast %58 : vector<8x1xf32> to vector<8x8xf32>
      %60 = arith.addf %56, %59 : vector<8x8xf32>
      %61 = arith.truncf %60 : vector<8x8xf32> to vector<8x8xbf16>
      %c0_38 = arith.constant 0 : index
      %c0_39 = arith.constant 0 : index
      %c0_40 = arith.constant 0 : index
      %62 = vector.load %arg8[%c0_38, %c0_39, %c0_40] : memref<4x8x8xbf16, #tpu.memory_space<vmem>>, vector<1x8x8xbf16>
      %63 = vector.shape_cast %62 : vector<1x8x8xbf16> to vector<8x8xbf16>
      %64 = vector.shape_cast %61 : vector<8x8xbf16> to vector<1x8x8xbf16>
      tpu.vector_store %arg8[%c0_38, %c0_39, %c0_40], %64 {strides = array<i32>} : memref<4x8x8xbf16, #tpu.memory_space<vmem>>, vector<1x8x8xbf16>,
      %c1 = arith.constant 1 : index
      %c0_41 = arith.constant 0 : index
      %c0_42 = arith.constant 0 : index
      %65 = vector.load %arg5[%c1, %c0_41, %c0_42] : memref<4x8x32xbf16, #tpu.memory_space<vmem>>, vector<1x8x32xbf16>
      %66 = vector.shape_cast %65 : vector<1x8x32xbf16> to vector<8x32xbf16>
      %cst_43 = arith.constant dense<0.000000e+00> : vector<8x8xf32>
      %67 = tpu.matmul %66, %53, %cst_43 {dimension_numbers = #tpu.dot_dimension_numbers<[1], [1], [0], [0], [0, 0, 1, 0], [], []>} : vector<8x32xbf16>, vector<8x32xbf16>, vector<8x8xf32> -> vector<8x8xf32>
      %c1_44 = arith.constant 1 : index
      %c0_45 = arith.constant 0 : index
      %c0_46 = arith.constant 0 : index
      %68 = vector.load %arg6[%c1_44, %c0_45, %c0_46] : memref<4x8x1xf32, #tpu.memory_space<vmem>>, vector<1x8x1xf32>
      %69 = vector.shape_cast %68 : vector<1x8x1xf32> to vector<8x1xf32>
      %70 = vector.broadcast %69 : vector<8x1xf32> to vector<8x8xf32>
      %71 = arith.addf %67, %70 : vector<8x8xf32>
      %72 = arith.truncf %71 : vector<8x8xf32> to vector<8x8xbf16>
      %c1_47 = arith.constant 1 : index
      %c0_48 = arith.constant 0 : index
      %c0_49 = arith.constant 0 : index
      %73 = vector.load %arg8[%c1_47, %c0_48, %c0_49] : memref<4x8x8xbf16, #tpu.memory_space<vmem>>, vector<1x8x8xbf16>
      %74 = vector.shape_cast %73 : vector<1x8x8xbf16> to vector<8x8xbf16>
      %75 = vector.shape_cast %72 : vector<8x8xbf16> to vector<1x8x8xbf16>
      tpu.vector_store %arg8[%c1_47, %c0_48, %c0_49], %75 {strides = array<i32>} : memref<4x8x8xbf16, #tpu.memory_space<vmem>>, vector<1x8x8xbf16>,
      %c2 = arith.constant 2 : index
      %c0_50 = arith.constant 0 : index
      %c0_51 = arith.constant 0 : index
      %76 = vector.load %arg5[%c2, %c0_50, %c0_51] : memref<4x8x32xbf16, #tpu.memory_space<vmem>>, vector<1x8x32xbf16>
      %77 = vector.shape_cast %76 : vector<1x8x32xbf16> to vector<8x32xbf16>
      %cst_52 = arith.constant dense<0.000000e+00> : vector<8x8xf32>
      %78 = tpu.matmul %77, %53, %cst_52 {dimension_numbers = #tpu.dot_dimension_numbers<[1], [1], [0], [0], [0, 0, 1, 0], [], []>} : vector<8x32xbf16>, vector<8x32xbf16>, vector<8x8xf32> -> vector<8x8xf32>
      %c2_53 = arith.constant 2 : index
      %c0_54 = arith.constant 0 : index
      %c0_55 = arith.constant 0 : index
      %79 = vector.load %arg6[%c2_53, %c0_54, %c0_55] : memref<4x8x1xf32, #tpu.memory_space<vmem>>, vector<1x8x1xf32>
      %80 = vector.shape_cast %79 : vector<1x8x1xf32> to vector<8x1xf32>
      %81 = vector.broadcast %80 : vector<8x1xf32> to vector<8x8xf32>
      %82 = arith.addf %78, %81 : vector<8x8xf32>
      %83 = arith.truncf %82 : vector<8x8xf32> to vector<8x8xbf16>
      %c2_56 = arith.constant 2 : index
      %c0_57 = arith.constant 0 : index
      %c0_58 = arith.constant 0 : index
      %84 = vector.load %arg8[%c2_56, %c0_57, %c0_58] : memref<4x8x8xbf16, #tpu.memory_space<vmem>>, vector<1x8x8xbf16>
      %85 = vector.shape_cast %84 : vector<1x8x8xbf16> to vector<8x8xbf16>
      %86 = vector.shape_cast %83 : vector<8x8xbf16> to vector<1x8x8xbf16>
      tpu.vector_store %arg8[%c2_56, %c0_57, %c0_58], %86 {strides = array<i32>} : memref<4x8x8xbf16, #tpu.memory_space<vmem>>, vector<1x8x8xbf16>,
      %c3 = arith.constant 3 : index
      %c0_59 = arith.constant 0 : index
      %c0_60 = arith.constant 0 : index
      %87 = vector.load %arg5[%c3, %c0_59, %c0_60] : memref<4x8x32xbf16, #tpu.memory_space<vmem>>, vector<1x8x32xbf16>
      %88 = vector.shape_cast %87 : vector<1x8x32xbf16> to vector<8x32xbf16>
      %cst_61 = arith.constant dense<0.000000e+00> : vector<8x8xf32>
      %89 = tpu.matmul %88, %53, %cst_61 {dimension_numbers = #tpu.dot_dimension_numbers<[1], [1], [0], [0], [0, 0, 1, 0], [], []>} : vector<8x32xbf16>, vector<8x32xbf16>, vector<8x8xf32> -> vector<8x8xf32>
      %c3_62 = arith.constant 3 : index
      %c0_63 = arith.constant 0 : index
      %c0_64 = arith.constant 0 : index
      %90 = vector.load %arg6[%c3_62, %c0_63, %c0_64] : memref<4x8x1xf32, #tpu.memory_space<vmem>>, vector<1x8x1xf32>
      %91 = vector.shape_cast %90 : vector<1x8x1xf32> to vector<8x1xf32>
      %92 = vector.broadcast %91 : vector<8x1xf32> to vector<8x8xf32>
      %93 = arith.addf %89, %92 : vector<8x8xf32>
      %94 = arith.truncf %93 : vector<8x8xf32> to vector<8x8xbf16>
      %c3_65 = arith.constant 3 : index
      %c0_66 = arith.constant 0 : index
      %c0_67 = arith.constant 0 : index
      %95 = vector.load %arg8[%c3_65, %c0_66, %c0_67] : memref<4x8x8xbf16, #tpu.memory_space<vmem>>, vector<1x8x8xbf16>
      %96 = vector.shape_cast %95 : vector<1x8x8xbf16> to vector<8x8xbf16>
      %97 = vector.shape_cast %94 : vector<8x8xbf16> to vector<1x8x8xbf16>
      tpu.vector_store %arg8[%c3_65, %c0_66, %c0_67], %97 {strides = array<i32>} : memref<4x8x8xbf16, #tpu.memory_space<vmem>>, vector<1x8x8xbf16>,
    } else {
    }
    %c8_i32 = arith.constant 8 : i32
    %3 = arith.muli %arg1, %c8_i32 : i32
    %4 = tpu.assume_multiple %3, 8 : i32
    %c0 = arith.constant 0 : index
    %5 = arith.index_cast %4 : i32 to index
    %c0_1 = arith.constant 0 : index
    %6 = vector.load %arg2[%c0, %5, %c0_1] : memref<1x8x32xbf16, #tpu.memory_space<vmem>>, vector<1x8x32xbf16>
    %7 = vector.shape_cast %6 : vector<1x8x32xbf16> to vector<8x32xbf16>
    %c0_2 = arith.constant 0 : index
    %c0_3 = arith.constant 0 : index
    %8 = vector.load %arg3[%c0_2, %c0_3] : memref<32x32xbf16, #tpu.memory_space<vmem>>, vector<32x32xbf16>
    %cst = arith.constant dense<0.000000e+00> : vector<8x32xf32>
    %9 = tpu.matmul %7, %8, %cst {dimension_numbers = #tpu.dot_dimension_numbers<[1], [0], [0], [1], [0, 0, 1, 1], [], []>} : vector<8x32xbf16>, vector<32x32xbf16>, vector<8x32xf32> -> vector<8x32xf32>
    %c0_4 = arith.constant 0 : index
    %c0_5 = arith.constant 0 : index
    %10 = vector.load %arg4[%c0_4, %c0_5] : memref<1x32xf32, #tpu.memory_space<vmem>>, vector<1x32xf32>
    %11 = vector.broadcast %10 : vector<1x32xf32> to vector<8x32xf32>
    %12 = arith.addf %9, %11 : vector<8x32xf32>
    %cst_6 = arith.constant 0.353553385 : f32
    %13 = vector.broadcast %cst_6 : f32 to vector<8x32xf32>
    %14 = arith.mulf %12, %13 : vector<8x32xf32>
    %15 = vector.extract_strided_slice %14 {offsets = [0, 0], sizes = [8, 8], strides = [1, 1]} : vector<8x32xf32> to vector<8x8xf32>
    %16 = arith.truncf %15 : vector<8x8xf32> to vector<8x8xbf16>
    %17 = vector.extract_strided_slice %14 {offsets = [0, 8], sizes = [8, 8], strides = [1, 1]} : vector<8x32xf32> to vector<8x8xf32>
    %18 = arith.truncf %17 : vector<8x8xf32> to vector<8x8xbf16>
    %19 = vector.extract_strided_slice %14 {offsets = [0, 16], sizes = [8, 8], strides = [1, 1]} : vector<8x32xf32> to vector<8x8xf32>
    %20 = arith.truncf %19 : vector<8x8xf32> to vector<8x8xbf16>
    %21 = vector.extract_strided_slice %14 {offsets = [0, 24], sizes = [8, 8], strides = [1, 1]} : vector<8x32xf32> to vector<8x8xf32>
    %22 = arith.truncf %21 : vector<8x8xf32> to vector<8x8xbf16>
    %cst_7 = arith.constant -1.000000e+30 : f32
    %23 = vector.broadcast %cst_7 : f32 to vector<8x1xf32>
    %c0_8 = arith.constant 0 : index
    %c0_9 = arith.constant 0 : index
    %24 = vector.load %arg10[%c0_8, %c0_9] : memref<8x1xf32, #tpu.memory_space<vmem>>, vector<8x1xf32>
    tpu.vector_store %arg10[%c0_8, %c0_9], %23 {strides = array<i32>} : memref<8x1xf32, #tpu.memory_space<vmem>>, vector<8x1xf32>,
    %cst_10 = arith.constant 0.000000e+00 : f32
    %25 = vector.broadcast %cst_10 : f32 to vector<8x1xf32>
    %c0_11 = arith.constant 0 : index
    %c0_12 = arith.constant 0 : index
    %26 = vector.load %arg11[%c0_11, %c0_12] : memref<8x1xf32, #tpu.memory_space<vmem>>, vector<8x1xf32>
    tpu.vector_store %arg11[%c0_11, %c0_12], %25 {strides = array<i32>} : memref<8x1xf32, #tpu.memory_space<vmem>>, vector<8x1xf32>,
    %27 = tpu.iota {dimensions = array<i32: 0>} : vector<8x8xi32>
    %28 = vector.broadcast %4 : i32 to vector<8x8xi32>
    %29 = arith.addi %28, %27 : vector<8x8xi32>
    %c7_i32 = arith.constant 7 : i32
    %30 = arith.addi %4, %c7_i32 : i32
    %c3_i32 = arith.constant 3 : i32
    %31 = arith.addi %30, %c3_i32 : i32
    %c0_i32_13 = arith.constant 0 : i32
    %32 = arith.cmpi sge, %31, %c0_i32_13 : i32
    %c3_i32_14 = arith.constant 3 : i32
    %33 = arith.subi %4, %c3_i32_14 : i32
    %c7_i32_15 = arith.constant 7 : i32
    %34 = arith.cmpi sle, %33, %c7_i32_15 : i32
    %35 = arith.andi %32, %34 : i1
    %36 = arith.extui %35 : i1 to i32
    %c0_i32_16 = arith.constant 0 : i32
    %37 = arith.cmpi ne, %36, %c0_i32_16 : i32
    scf.if %37 {
      %c0_28 = arith.constant 0 : index
      %c0_29 = arith.constant 0 : index
      %c0_30 = arith.constant 0 : index
      %52 = vector.load %arg8[%c0_28, %c0_29, %c0_30] : memref<4x8x8xbf16, #tpu.memory_space<vmem>>, vector<1x8x8xbf16>
      %53 = vector.shape_cast %52 : vector<1x8x8xbf16> to vector<8x8xbf16>
      %cst_31 = arith.constant dense<0.000000e+00> : vector<8x8xf32>
      %54 = tpu.matmul %16, %53, %cst_31 {dimension_numbers = #tpu.dot_dimension_numbers<[1], [0], [0], [1], [0, 0, 1, 1], [], []>} : vector<8x8xbf16>, vector<8x8xbf16>, vector<8x8xf32> -> vector<8x8xf32>
      %c1 = arith.constant 1 : index
      %c0_32 = arith.constant 0 : index
      %c0_33 = arith.constant 0 : index
      %55 = vector.load %arg8[%c1, %c0_32, %c0_33] : memref<4x8x8xbf16, #tpu.memory_space<vmem>>, vector<1x8x8xbf16>
      %56 = vector.shape_cast %55 : vector<1x8x8xbf16> to vector<8x8xbf16>
      %cst_34 = arith.constant dense<0.000000e+00> : vector<8x8xf32>
      %57 = tpu.matmul %18, %56, %cst_34 {dimension_numbers = #tpu.dot_dimension_numbers<[1], [0], [0], [1], [0, 0, 1, 1], [], []>} : vector<8x8xbf16>, vector<8x8xbf16>, vector<8x8xf32> -> vector<8x8xf32>
      %58 = arith.maximumf %54, %57 : vector<8x8xf32>
      %c2 = arith.constant 2 : index
      %c0_35 = arith.constant 0 : index
      %c0_36 = arith.constant 0 : index
      %59 = vector.load %arg8[%c2, %c0_35, %c0_36] : memref<4x8x8xbf16, #tpu.memory_space<vmem>>, vector<1x8x8xbf16>
      %60 = vector.shape_cast %59 : vector<1x8x8xbf16> to vector<8x8xbf16>
      %cst_37 = arith.constant dense<0.000000e+00> : vector<8x8xf32>
      %61 = tpu.matmul %20, %60, %cst_37 {dimension_numbers = #tpu.dot_dimension_numbers<[1], [0], [0], [1], [0, 0, 1, 1], [], []>} : vector<8x8xbf16>, vector<8x8xbf16>, vector<8x8xf32> -> vector<8x8xf32>
      %62 = arith.maximumf %58, %61 : vector<8x8xf32>
      %c3 = arith.constant 3 : index
      %c0_38 = arith.constant 0 : index
      %c0_39 = arith.constant 0 : index
      %63 = vector.load %arg8[%c3, %c0_38, %c0_39] : memref<4x8x8xbf16, #tpu.memory_space<vmem>>, vector<1x8x8xbf16>
      %64 = vector.shape_cast %63 : vector<1x8x8xbf16> to vector<8x8xbf16>
      %cst_40 = arith.constant dense<0.000000e+00> : vector<8x8xf32>
      %65 = tpu.matmul %22, %64, %cst_40 {dimension_numbers = #tpu.dot_dimension_numbers<[1], [0], [0], [1], [0, 0, 1, 1], [], []>} : vector<8x8xbf16>, vector<8x8xbf16>, vector<8x8xf32> -> vector<8x8xf32>
      %66 = arith.maximumf %62, %65 : vector<8x8xf32>
      %67 = tpu.iota {dimensions = array<i32: 1>} : vector<8x8xi32>
      %c0_i32_41 = arith.constant 0 : i32
      %68 = vector.broadcast %c0_i32_41 : i32 to vector<8x8xi32>
      %69 = arith.addi %68, %67 : vector<8x8xi32>
      %70 = arith.subi %29, %69 : vector<8x8xi32>
      %71 = math.absi %70 : vector<8x8xi32>
      %c3_i32_42 = arith.constant 3 : i32
      %72 = vector.broadcast %c3_i32_42 : i32 to vector<8x8xi32>
      %73 = arith.cmpi sle, %71, %72 : vector<8x8xi32>
      %c8_i32_43 = arith.constant 8 : i32
      %74 = vector.broadcast %c8_i32_43 : i32 to vector<8x8xi32>
      %75 = arith.cmpi slt, %69, %74 : vector<8x8xi32>
      %76 = arith.andi %73, %75 : vector<8x8xi1>
      %cst_44 = arith.constant 0.000000e+00 : f32
      %cst_45 = arith.constant -1.000000e+04 : f32
      %77 = vector.broadcast %cst_44 : f32 to vector<8x8xf32>
      %78 = vector.broadcast %cst_45 : f32 to vector<8x8xf32>
      %79 = arith.select %76, %77, %78 : vector<8x8xi1>, vector<8x8xf32>
      %80 = arith.addf %66, %79 : vector<8x8xf32>
      %c0_46 = arith.constant 0 : index
      %c0_47 = arith.constant 0 : index
      %81 = vector.load %arg9[%c0_46, %c0_47] : memref<8x8xf32, #tpu.memory_space<vmem>>, vector<8x8xf32>
      tpu.vector_store %arg9[%c0_46, %c0_47], %80 {strides = array<i32>} : memref<8x8xf32, #tpu.memory_space<vmem>>, vector<8x8xf32>,
      %c0_48 = arith.constant 0 : index
      %c0_49 = arith.constant 0 : index
      %82 = vector.load %arg10[%c0_48, %c0_49] : memref<8x1xf32, #tpu.memory_space<vmem>>, vector<8x1xf32>
      %cst_50 = arith.constant dense<0xFF800000> : vector<8xf32>
      %83 = vector.multi_reduction <maximumf>, %80, %cst_50 [1] : vector<8x8xf32> to vector<8xf32>
      %84 = vector.shape_cast %83 : vector<8xf32> to vector<8x1xf32>
      %85 = arith.maximumf %82, %84 : vector<8x1xf32>
      %c0_51 = arith.constant 0 : index
      %c0_52 = arith.constant 0 : index
      %86 = vector.load %arg11[%c0_51, %c0_52] : memref<8x1xf32, #tpu.memory_space<vmem>>, vector<8x1xf32>
      %87 = arith.subf %82, %85 : vector<8x1xf32>
      %88 = math.exp %87 : vector<8x1xf32>
      %89 = arith.mulf %86, %88 : vector<8x1xf32>
      %90 = vector.broadcast %85 : vector<8x1xf32> to vector<8x8xf32>
      %91 = arith.subf %80, %90 : vector<8x8xf32>
      %92 = math.exp %91 : vector<8x8xf32>
      %cst_53 = arith.constant dense<0.000000e+00> : vector<8xf32>
      %93 = vector.multi_reduction <add>, %92, %cst_53 [1] : vector<8x8xf32> to vector<8xf32>
      %94 = vector.shape_cast %93 : vector<8xf32> to vector<8x1xf32>
      %95 = arith.addf %89, %94 : vector<8x1xf32>
      %c0_54 = arith.constant 0 : index
      %c0_55 = arith.constant 0 : index
      %96 = vector.load %arg11[%c0_54, %c0_55] : memref<8x1xf32, #tpu.memory_space<vmem>>, vector<8x1xf32>
      tpu.vector_store %arg11[%c0_54, %c0_55], %95 {strides = array<i32>} : memref<8x1xf32, #tpu.memory_space<vmem>>, vector<8x1xf32>,
      %c0_56 = arith.constant 0 : index
      %c0_57 = arith.constant 0 : index
      %97 = vector.load %arg10[%c0_56, %c0_57] : memref<8x1xf32, #tpu.memory_space<vmem>>, vector<8x1xf32>
      tpu.vector_store %arg10[%c0_56, %c0_57], %85 {strides = array<i32>} : memref<8x1xf32, #tpu.memory_space<vmem>>, vector<8x1xf32>,
    } else {
    }
    %c0_17 = arith.constant 0 : index
    %c0_18 = arith.constant 0 : index
    %38 = vector.load %arg10[%c0_17, %c0_18] : memref<8x1xf32, #tpu.memory_space<vmem>>, vector<8x1xf32>
    %c0_19 = arith.constant 0 : index
    %c0_20 = arith.constant 0 : index
    %39 = vector.load %arg11[%c0_19, %c0_20] : memref<8x1xf32, #tpu.memory_space<vmem>>, vector<8x1xf32>
    %40 = tpu.reciprocal %39 : vector<8x1xf32> -> vector<8x1xf32>
    %c7_i32_21 = arith.constant 7 : i32
    %41 = arith.addi %4, %c7_i32_21 : i32
    %c3_i32_22 = arith.constant 3 : i32
    %42 = arith.addi %41, %c3_i32_22 : i32
    %c0_i32_23 = arith.constant 0 : i32
    %43 = arith.cmpi sge, %42, %c0_i32_23 : i32
    %c3_i32_24 = arith.constant 3 : i32
    %44 = arith.subi %4, %c3_i32_24 : i32
    %c7_i32_25 = arith.constant 7 : i32
    %45 = arith.cmpi sle, %44, %c7_i32_25 : i32
    %46 = arith.andi %43, %45 : i1
    %47 = arith.extui %46 : i1 to i32
    %c0_i32_26 = arith.constant 0 : i32
    %48 = arith.cmpi ne, %47, %c0_i32_26 : i32
    scf.if %48 {
      %c0_28 = arith.constant 0 : index
      %c0_29 = arith.constant 0 : index
      %52 = vector.load %arg9[%c0_28, %c0_29] : memref<8x8xf32, #tpu.memory_space<vmem>>, vector<8x8xf32>
      %53 = vector.broadcast %38 : vector<8x1xf32> to vector<8x8xf32>
      %54 = arith.subf %52, %53 : vector<8x8xf32>
      %55 = math.exp %54 : vector<8x8xf32>
      %56 = vector.broadcast %40 : vector<8x1xf32> to vector<8x8xf32>
      %57 = arith.mulf %55, %56 : vector<8x8xf32>
      %c0_30 = arith.constant 0 : index
      %c0_31 = arith.constant 0 : index
      %c0_32 = arith.constant 0 : index
      %58 = vector.load %arg7[%c0_30, %c0_31, %c0_32] : memref<1x8x8xf32, #tpu.memory_space<vmem>>, vector<1x8x8xf32>
      %59 = vector.shape_cast %58 : vector<1x8x8xf32> to vector<8x8xf32>
      %60 = vector.shape_cast %57 : vector<8x8xf32> to vector<1x8x8xf32>
      tpu.vector_store %arg7[%c0_30, %c0_31, %c0_32], %60 {strides = array<i32>} : memref<1x8x8xf32, #tpu.memory_space<vmem>>, vector<1x8x8xf32>,
    } else {
    }
    %true = arith.constant true
    %49 = arith.xori %46, %true : i1
    %50 = arith.extui %49 : i1 to i32
    %c0_i32_27 = arith.constant 0 : i32
    %51 = arith.cmpi ne, %50, %c0_i32_27 : i32
    scf.if %51 {
      %cst_28 = arith.constant 0.000000e+00 : f32
      %52 = vector.broadcast %cst_28 : f32 to vector<8x8xf32>
      %c0_29 = arith.constant 0 : index
      %c0_30 = arith.constant 0 : index
      %c0_31 = arith.constant 0 : index
      %53 = vector.load %arg7[%c0_29, %c0_30, %c0_31] : memref<1x8x8xf32, #tpu.memory_space<vmem>>, vector<1x8x8xf32>
      %54 = vector.shape_cast %53 : vector<1x8x8xf32> to vector<8x8xf32>
      %55 = vector.shape_cast %52 : vector<8x8xf32> to vector<1x8x8xf32>
      tpu.vector_store %arg7[%c0_29, %c0_30, %c0_31], %55 {strides = array<i32>} : memref<1x8x8xf32, #tpu.memory_space<vmem>>, vector<1x8x8xf32>,
    } else {
    }
    return
  }
  func.func @transform_0(%arg0: i32, %arg1: i32) -> (i32, i32, i32) {
    %c0_i32 = arith.constant 0 : i32
    %c0_i32_0 = arith.constant 0 : i32
    %c0_i32_1 = arith.constant 0 : i32
    return %arg0, %c0_i32, %c0_i32_0 : i32, i32, i32
  }
  func.func @transform_1(%arg0: i32, %arg1: i32) -> (i32, i32) {
    %c0_i32 = arith.constant 0 : i32
    %c0_i32_0 = arith.constant 0 : i32
    %c0_i32_1 = arith.constant 0 : i32
    return %c0_i32, %c0_i32_0 : i32, i32
  }
  func.func @transform_2(%arg0: i32, %arg1: i32) -> (i32, i32) {
    %c0_i32 = arith.constant 0 : i32
    %c0_i32_0 = arith.constant 0 : i32
    %c0_i32_1 = arith.constant 0 : i32
    return %c0_i32, %c0_i32_0 : i32, i32
  }
  func.func @transform_3(%arg0: i32, %arg1: i32) -> (i32, i32, i32) {
    %c0_i32 = arith.constant 0 : i32
    %c0_i32_0 = arith.constant 0 : i32
    %c0_i32_1 = arith.constant 0 : i32
    %c0_i32_2 = arith.constant 0 : i32
    return %c0_i32, %c0_i32_0, %c0_i32_1 : i32, i32, i32
  }
  func.func @transform_4(%arg0: i32, %arg1: i32) -> (i32, i32, i32) {
    %c0_i32 = arith.constant 0 : i32
    %c0_i32_0 = arith.constant 0 : i32
    %c0_i32_1 = arith.constant 0 : i32
    %c0_i32_2 = arith.constant 0 : i32
    return %c0_i32, %c0_i32_0, %c0_i32_1 : i32, i32, i32
  }
  func.func @transform_5(%arg0: i32, %arg1: i32) -> (i32, i32, i32) {
    %c0_i32 = arith.constant 0 : i32
    %c0_i32_0 = arith.constant 0 : i32
    return %arg0, %arg1, %c0_i32 : i32, i32, i32
  }
}

</mosaic_0001>

<bundles_post_ra>
// kernel: tpu_custom_call.1
= control target key start
LH: loop header
LB: loop body
LE: loop exit
PB: predicated region body
PF: predicated region fallthrough
CT: control target
= control target key end

     0   :  { %10 = vsyncpa [#allocation7], 0  ;;  %s1542_s0 = inlined_call_operand.hbm [shape: bf16[2,8,32], index: 0, kind: input, shape index: {}]   ;;  %s1543_s1 = inlined_call_operand.vmem [shape: bf16[32,32], index: 1, kind: input, shape index: {}]   ;;  %s1544_s2 = inlined_call_operand.vmem [shape: f32[1,32], index: 2, kind: input, shape index: {}]   ;;  %s1545_s3 = inlined_call_operand.vmem [shape: bf16[4,8,32], index: 3, kind: input, shape index: {}]   ;;  %s1546_s4 = inlined_call_operand.vmem [shape: f32[4,8,1], index: 4, kind: input, shape index: {}]   ;;  %s1547_s5 = inlined_call_operand.hbm [shape: f32[2,8,8], index: 5, kind: output, shape index: {}]  }
   0x1   :  { %12 = vsyncpa [#allocation7 + $0x1], 0 }
   0x2   :  { %13 = vsyncpa [#allocation8], 0 }
   0x3   :  { %15 = vsyncpa [#allocation8 + $0x1], 0  ;;  %s1277_s18 = smov 0   ;;  %s1279_s19 = smov 0  }
   0x4   :  { %s1281_s20 = smov 0   ;;  %s1283_s21 = smov 0  }
   0x5   :  { %s1285_s22 = smov 0   ;;  %s1287_s23 = smov 0  }
   0x6 LB: > { %s934_s24 = sadd.s32 4294967295, %s1235_s23   ;;  %s935_s25 = sadd.s32 4294967294, %s1235_s23   ;;  %s1235_s23 = sphi %s1287_s23, %s21_s23   ;;  %s1231_s22 = sphi %s1285_s22, %s1563_s22   ;;  %s1227_s21 = sphi %s1283_s21, %s1562_s21   ;;  %s1223_s20 = sphi %s1281_s20, %s1561_s20   ;;  %s1219_s19 = sphi %s1279_s19, %s1560_s19   ;;  %s1215_s18 = sphi %s1277_s18, %s1559_s18  }
   0x7   : > { %s33_s26 = sadd.s32 1, %s1231_s22  ;;  %s40_s27 = sadd.s32 1, %s1223_s20 }
   0x8   : > { %p35_p0 = scmp.ge.s32.totalorder %s33_s26, 2  ;;  %p47_p1 = scmp.ne.s32.totalorder %s1223_s20, %s1219_s19 }
   0x9   : > { %p48_p2 = scmp.eq.s32.totalorder %s1235_s23, 0  ;;  %p53_p3 = scmp.ne.s32.totalorder %s1219_s19, %s1215_s18 }
   0xa   : > { %s1565_s26 = smov (%p35_p0, %s33_s26), 0  ;;  %p54_p5 = scmp.eq.s32.totalorder %s934_s24, 0 }
   0xb   : > { %p1318_p4 = por %p48_p2, %p47_p1  ;;  %s37_s29 = ssub.s32 %s1231_s22, %s1565_s26 }
   0xc   : > { %p163_p6 = scmp.eq.s32.totalorder %s934_s24, 1  ;;  %p38_p7 = scmp.eq.s32.totalorder %s37_s29, 0 }
   0xd   : > { %p1324_p8 = por %p54_p5, %p53_p3  ;;  %p169_p10 = scmp.eq.s32.totalorder %s935_s25, 1 }
   0xe   : > { %p1328_p9 = por %p163_p6, %p47_p1  ;;  %p1053_p13 = scmp.lt.s32.totalorder %s1235_s23, 2 }
   0xf   : > { %s1333_s7 = scalar_select %p38_p7, %s1223_s20, %s40_s27  }
  0x10   : > { %s1551_s6 = scalar_select %p1328_p9, 1, 0 }
  0x11   : > { %p1335_p11 = por %p169_p10, %p53_p3  ;;  %s201_s9 = sand.u32 1, %s1223_s20  }
  0x12   : > { %s938_s10 = sshll.u32 %s201_s9, 2  ;;  %s939_s11 = sshll.u32 %s1231_s22, 6 }
  0x13   : > { %s1552_s8 = scalar_select %p1335_p11, 1, 0 }
  0x14   : > { %s1346_s14 = scalar_lea.hbm %s1542_s0, %s939_s11  ;;  %s205_s15 = scalar_lea.vmem [#allocation6], %s938_s10 }
  0x15   : > { %s212_s16 = sshll.u32 %s205_s15, 4  ;;  %p1352_p0 = pnand %p1053_p13, %p1318_p4  ;;  %s1348_s16 = int_to_ptr.vmem [resolvable:$true] %s212_s16 }
  0x16   : > { %s202_s24 = scalar_lea.sflag [#allocation7], %s201_s9  ;;  %s1123_s25 = scalar_lea.hbm %s1346_s14, 64 }
  0x17   : > { %p1124_p3 = scmp.ne.s32.totalorder %s1346_s14, %s1123_s25  ;;  %p1125_p5 = pneg %p1352_p0 }
  0x18   : > { %s1128_s28 = scalar_lea.hbm %s1542_s0, 128  ;;  %p1129_p4 = scmp.lt.u32.totalorder %s1346_s14, %s1542_s0 }
  0x19   : > { %p1126_p6 = pnand %p1125_p5, %p1124_p3  ;;  %p1130_p10 = scmp.lt.u32.totalorder %s1128_s28, %s1123_s25 }
  0x1a   : > { %p1132_p12 = scmp.lt.u32.totalorder %s1123_s25, %s1346_s14 }
  0x1b   : > { %p1127_p7 = pneg %p1126_p6  ;;  %p1131_p13 = por %p1130_p10, %p1129_p4 }
  0x1d   : > { %p1133_p1 = por %p1132_p12, %p1131_p13 }
  0x1f   : > { %p1134_p2 = pnand %p1133_p1, %p1127_p7 }
  0x21   : > { %1137 = shalt.err (!%p1134_p2)
}
  0x22   : > { %s1138_s9 = scalar_lea.vmem %s1348_s16, 64  ;;  %s1237_s12 = smov [#allocation6]  }
  0x23   : > { %p1139_p3 = scmp.ne.s32.totalorder %s1348_s16, %s1138_s9  ;;  %s1143_s13 = sshll.u32 %s1237_s12, 4  ;;  %s1144_s13 = int_to_ptr.vmem [resolvable:$false] %s1143_s13 }
  0x24   : > { %s1145_s15 = scalar_lea.vmem %s1144_s13, 128  ;;  %p1146_p9 = scmp.lt.s32.totalorder %s1348_s16, %s1144_s13 }
  0x25   : > { %p1141_p6 = pnand %p1139_p3, %p1125_p5  ;;  %p1147_p4 = scmp.lt.s32.totalorder %s1145_s15, %s1138_s9 }
  0x27   : > { %p1142_p11 = pneg %p1141_p6  ;;  %p1148_p10 = por %p1147_p4, %p1146_p9 }
  0x29   : > { %p1149_p12 = pnand %p1148_p10, %p1142_p11 }
  0x2b   : > { %1152 = shalt.err (!%p1149_p12)
}
  0x2c   : > { %1048 = dma.hbm_to_vmem [thread:$0]  (!%p1352_p0), %s1346_s14, 64, %s1348_s16, %s202_s24  }
  0x2d   : > { %p1554_p1 = scmp.lt.s32.totalorder %s1235_s23, 3  ;;  %p1555_p2 = scmp.ge.s32.totalorder %s1235_s23, 1 }
  0x2f   : > { %p218_p5 = pnand %p1555_p2, %p1554_p1 }
  0x30   : > { %s1388_s25 = sand.u32 (!%p218_p5), 1, %s1219_s19  }
  0x31   : > { %221 = sbr.rel (%p218_p5) target bundleno = 1237 (0x4d5), region = 40  ;;  %s941_s27 = sshll.u32 (!%p218_p5), %s1388_s25, 2 }
  0x32   : > { %s224_s29 = scalar_lea.sflag (!%p218_p5), [#allocation7], %s1388_s25  ;;  %s1392_s28 = scalar_lea.vmem (!%p218_p5), [#allocation6], %s941_s27 }
  0x38   : > { %1206 = dma.done.wait (%p1324_p8), %s224_s29, 64  }
  0x39   : > { %1208 = vsyncadd (%p1324_p8), %s224_s29, 4294967232  ;;  %v1238_v0 = vmov 0.0   ;;  %vm1239_vm0 = vmmov 0   ;;  %v1240_v1 = vmov 0   ;;  %vm267_vm1 = vcmask 261120   ;;  %v261_v4 = vld [vmem:[%s1546_s4] sm:$0xff] }
  0x3a   : > { %985 = vmatprep.subr.bf16.mxu0 %v1238_v0  ;;  %987 = vmatprep.mubr.msk.bf16.mxu0 %vm1239_vm0, %v1238_v0  ;;  %v259_v2 = vld [vmem:[%s1392_s28] sm:$0xf]  ;;  %v948_v5 = vld [vmem:[%s1546_s4 + $0x10] sm:$0xff]  ;;  %v951_v7 = vld [vmem:[%s1546_s4 + $0x18] sm:$0xff]  ;;  %vm315_vm2 = vcmask 60416   ;;  %vm577_vm3 = vcmask 1043456  }
  0x3b   : > { %1111 = vset.pattern.permute.xlu0 %v1240_v1  ;;  %1112 = vset.pattern.permute.xlu1 %v1240_v1  ;;  %v272_v3 = vsel %vm267_vm1, %v259_v2, 0  ;;  %v945_v6 = vld [vmem:[%s1546_s4 + $0x8] sm:$0xff]  ;;  %v260_v8 = vld [vmem:[%s1545_s3] sm:$0xf]  ;;  %v944_v9 = vld [vmem:[%s1545_s3 + $0x4] sm:$0xf] }
  0x3c   : > { %991 = vmatprep.subr.bf16.mxu1 %v1238_v0  ;;  %993 = vmatprep.mubr.msk.bf16.mxu1 %vm1239_vm0, %v1238_v0  ;;  %v947_v10 = vld [vmem:[%s1545_s3 + $0x8] sm:$0xf]  ;;  %v1113_v11 = vld [vmem:[%s1543_s1] sm:$0xff]   ;;  %v950_v12 = vld [vmem:[%s1545_s3 + $0xc] sm:$0xf]  ;;  %vm573_vm4 = vcmask 64512  }
  0x3d   : > { %986 = vmatpush3.bf16.xpose.msra.mxu0 %v272_v3  ;;  %992 = vmatpush3.bf16.xpose.msra.mxu1 %v272_v3  ;;  %v1114_v13 = vld [vmem:[%s1543_s1 + $0x8] sm:$0xff]   ;;  %v953_v47 = vld [vmem:[%s1544_s2] ss:$0 sm:$0xff]  ;;  %s1241_s12 = smov 112   ;;  %s1242_s13 = smov 120   ;;  %vm557_vm5 = vcmask 7168  }
  0x3e   : > { %997 = vmatprep.subr.bf16.mxu0 %v1238_v0  ;;  %1003 = vmatprep.subr.bf16.mxu1 %v1238_v0  ;;  %v487_v14 = vld [vmem:[%s1392_s28] sm:$0xf]  ;;  %s1243_s15 = smov 104   ;;  %v1244_v1 = vmov -1e+30   ;;  %559 = vst.msk [vmem:[#allocation5] sm:$0xff] %vm557_vm5, %v1238_v0 }
  0x3f   : > { %264 = vperm.xlu0 %1111, %v261_v4   ;;  %378 = vperm.xlu1 %1112, %v948_v5   ;;  %558 = vst.msk [vmem:[#allocation4] sm:$0xff] %vm557_vm5, %v1244_v1  ;;  %v560_v4 = vlaneseq  ;;  %s942_s27 = sshll.u32 %s1388_s25, 3  ;;  %s963_s29 = sshll.u32 %s1227_s21, 7 }
  0x40   : > { %s253_s30 = scalar_lea.vmem [#allocation9], %s942_s27  ;;  %s1492_s24 = scalar_lea.hbm %s1547_s5, %s963_s29 }
  0x41   : > { %v561_v5 = vshrl.u32 %v560_v4, 7  ;;  %s853_s14 = sshll.u32 %s253_s30, 4  ;;  %s839_s10 = scalar_lea.sflag [#allocation8], %s1388_s25  ;;  %s1494_s14 = int_to_ptr.vmem [resolvable:$true] %s853_s14 }
  0x42   : > { %s1153_s11 = scalar_lea.vmem %s1494_s14, 128  ;;  %p1556_p9 = scmp.ne.s32.totalorder %s1551_s6, 0 }
  0x43   : > { %323 = vperm.xlu0 %1111, %v945_v6   ;;  %433 = vperm.xlu1 %1112, %v951_v7   ;;  %v776_v6 = vand.u32 127, %v560_v4  ;;  %p1154_p8 = scmp.ne.s32.totalorder %s1494_s14, %s1153_s11  ;;  %s1246_s21 = smov [#allocation9]  }
  0x44   : > { %988 = vmatmul.mubr.msk.bf16.vlgmr.msra.gmra.mrb[0].mxu0 %vm267_vm1, %v260_v8  ;;  %994 = vmatmul.mubr.msk.bf16.vlgmr.msra.gmra.mrb[0].mxu1 %vm267_vm1, %v944_v9  ;;  %s1157_s28 = sshll.u32 %s1246_s21, 4  ;;  %s1158_s28 = int_to_ptr.vmem [resolvable:$false] %s1157_s28 }
  0x45   : > { %998 = vmatpush3.bf16.xpose.msra.mxu0 %v272_v3  ;;  %999 = vmatprep.mubr.msk.bf16.mxu0 %vm1239_vm0, %v1238_v0  ;;  %v777_v7 = vsub.s32 %v561_v5, %v776_v6  ;;  %vm782_vm7 = vcmp.lt.s32.totalorder %v776_v6, 8  ;;  %p1155_p11 = pnand %p1154_p8, %p1556_p9  ;;  %s1159_s9 = scalar_lea.vmem %s1158_s28, 256 }
  0x46   : > { %1009 = vmatprep.subr.bf16.mxu0 %v1238_v0  ;;  %1004 = vmatpush3.bf16.xpose.msra.mxu1 %v272_v3  ;;  %p1160_p7 = scmp.lt.s32.totalorder %s1494_s14, %s1158_s28  ;;  %p1161_p13 = scmp.lt.s32.totalorder %s1159_s9, %s1153_s11 }
  0x47   : > { %1005 = vmatprep.mubr.msk.bf16.mxu1 %vm1239_vm0, %v1238_v0  ;;  %1017 = vmatprep.subr.bf16.mxu1 %v1238_v0  ;;  %v779_v8 = vsub.s32 0, %v777_v7  ;;  %p1156_p0 = pneg %p1155_p11 }
  0x48   : > { %p1162_p3 = por %p1161_p13, %p1160_p7 }
  0x49   : > { %v961_v9 = vmin.u32 %v779_v8, %v777_v7 }
  0x4a   : > { %p1163_p6 = pnand %p1162_p3, %p1156_p0 }
  0x4b   : > { %vm781_vm6 = vcmp.le.s32.totalorder %v961_v9, 3 }
  0x4c   : > { %1000 = vmatmul.mubr.msk.bf16.vlgmr.msra.gmra.mrb[4].mxu0 %vm267_vm1, %v947_v10  ;;  %vm783_vm8 = vmand %vm781_vm6, %vm782_vm7 }
  0x4d   : > { %1010 = vmatpush3.bf16.msra.mxu0 %v1113_v11  ;;  %1013 = vmatprep.mubr.msk.bf16.mxu0 %vm1239_vm0, %v1238_v0 }
  0x4e   : > { %1011 = vmatprep.subr.bf16.mxu0 %v1238_v0  ;;  %1006 = vmatmul.mubr.msk.bf16.vlgmr.msra.gmra.mrb[4].mxu1 %vm267_vm1, %v950_v12 }
  0x4f   : > { %1019 = vmatprep.mubr.msk.bf16.mxu1 %vm1239_vm0, %v1238_v0 }
  0x51   : > { %1012 = vmatpush3.bf16.msra.mxu0 %v1114_v13 }
  0x52   : > { %1023 = vmatprep.subr.bf16.mxu0 %v1238_v0 }
  0x54   : > { %1014 = vmatmul.mubr.msk.bf16.vlgmr.msra.gmra.mrb[8].mxu0 %vm267_vm1, %v487_v14 }
  0x55   : > { %1025 = vmatprep.mubr.msk.bf16.mxu0 %vm1239_vm0, %v1238_v0 }
  0xbe   : > { %v265_v15 = vpop.permute.xlu0 %264  ;;  %v379_v29 = vpop.permute.xlu1 %378 }
  0xc2   : > { %v324_v16 = vpop.permute.xlu0 %323  ;;  %v434_v31 = vpop.permute.xlu1 %433 }
 0x117   : > { %v308_v17 = vpop.f32.mrb[0].mxu0  ;;  %v363_v18 = vpop.f32.mrb[0].mxu1 }
 0x118   : > { %v309_v19 = vadd.f32 %v308_v17, %v265_v15  ;;  %v989_v20 = vpop.f32.mrb[1].mxu0  ;;  %v364_v21 = vadd.f32 %v363_v18, %v324_v16  ;;  %v995_v22 = vpop.f32.mrb[1].mxu1 }
 0x119   : > { %v311_v23 = vpop.f32.mrb[2].mxu0  ;;  %v366_v24 = vpop.f32.mrb[2].mxu1  ;;  %v1245_v20 = vmov -10000.0  }
 0x11a   : > { %v314_v25 = vpack.c.bf16 %v309_v19, %v309_v19  ;;  %v990_v26 = vpop.f32.mrb[3].mxu0  ;;  %v369_v27 = vpack.c.bf16 %v364_v21, %v364_v21  ;;  %v996_v28 = vpop.f32.mrb[3].mxu1  ;;  %v784_v21 = vsel %vm783_vm8, 0.0, %v1245_v20 }
 0x11b   : > { %v787_v28 = vld [vmem:[#allocation4] sm:$0xff] }
 0x11c   : > { %316 = vst.msk [vmem:[#allocation2] sm:$0xf] %vm315_vm2, %v314_v25  ;;  %371 = vst.msk [vmem:[#allocation2 + $0x4] sm:$0xf] %vm315_vm2, %v369_v27 }
 0x11f   : > { %v418_v30 = vpop.f32.mrb[4].mxu0 }
 0x120   : > { %v419_v32 = vadd.f32 %v418_v30, %v379_v29  ;;  %v1001_v33 = vpop.f32.mrb[5].mxu0 }
 0x121   : > { %v421_v34 = vpop.f32.mrb[6].mxu0  ;;  %v473_v35 = vpop.f32.mrb[4].mxu1 }
 0x122   : > { %v424_v36 = vpack.c.bf16 %v419_v32, %v419_v32  ;;  %v1002_v37 = vpop.f32.mrb[7].mxu0  ;;  %v474_v38 = vadd.f32 %v473_v35, %v434_v31  ;;  %v1007_v39 = vpop.f32.mrb[5].mxu1 }
 0x123   : > { %v572_v40 = vld [vmem:[#allocation2] sm:$0xf]  ;;  %v476_v41 = vpop.f32.mrb[6].mxu1  ;;  %v622_v42 = vld [vmem:[#allocation2 + $0x4] sm:$0xf] }
 0x124   : > { %426 = vst.msk [vmem:[#allocation2 + $0x8] sm:$0xf] %vm315_vm2, %v424_v36  ;;  %v579_v43 = vsel %vm577_vm3, %v572_v40, 0  ;;  %v479_v44 = vpack.c.bf16 %v474_v38, %v474_v38  ;;  %v1008_v45 = vpop.f32.mrb[7].mxu1  ;;  %v630_v46 = vsel %vm577_vm3, %v622_v42, 0  ;;  %v792_v40 = vld [vmem:[#allocation5] sm:$0xff] }
 0x125   : > { %1018 = vmatpush3.bf16.msra.mxu1 %v579_v43  ;;  %1024 = vmatpush3.bf16.msra.mxu0 %v630_v46 }
 0x126   : > { %1029 = vmatprep.subr.bf16.mxu1 %v1238_v0  ;;  %481 = vst.msk [vmem:[#allocation2 + $0xc] sm:$0xf] %vm315_vm2, %v479_v44  ;;  %1035 = vmatprep.subr.bf16.mxu0 %v1238_v0 }
 0x127   : > { %v549_v48 = vpop.f32.mrb[8].mxu0 }
 0x128   : > { %v550_v49 = vadd.f32 %v953_v47, %v549_v48  ;;  %v1015_v50 = vpop.f32.mrb[9].mxu0 }
 0x129   : > { %v552_v51 = vpop.f32.mrb[10].mxu0 }
 0x12a   : > { %v555_v52 = vmul.f32 0.35355338, %v550_v49  ;;  %v1016_v53 = vpop.f32.mrb[11].mxu0 }
 0x12b   : > { %v674_v54 = vld [vmem:[#allocation2 + $0x8] sm:$0xf] }
 0x12c   : > { %v556_v55 = vpack.c.bf16 %v555_v52, %v555_v52  ;;  %v681_v56 = vsel %vm577_vm3, %v674_v54, 0 }
 0x12d   : > { %v725_v57 = vld [vmem:[#allocation2 + $0xc] sm:$0xf] }
 0x12e   : > { %675 = vrot.lane.b32.xlu1 %v556_v55, %s1241_s12  ;;  %624 = vrot.lane.b32.xlu0 %v556_v55, %s1242_s13  ;;  %v732_v58 = vsel %vm577_vm3, %v725_v57, 0 }
 0x12f   : > { %1020 = vmatmul.mubr.msk.bf16.vlgmr.msra.gmra.mrb[8].mxu1 %vm573_vm4, %v556_v55 }
 0x130   : > { %1030 = vmatpush3.bf16.msra.mxu1 %v681_v56  ;;  %1031 = vmatprep.mubr.msk.bf16.mxu1 %vm1239_vm0, %v1238_v0 }
 0x132   : > { %726 = vrot.lane.b32.xlu0 %v556_v55, %s1243_s15 }
 0x1a0   : > { %v676_v59 = vpop.permute.xlu1 %675  ;;  %v625_v60 = vpop.permute.xlu0 %624 }
 0x1a1   : > { %1026 = vmatmul.mubr.msk.bf16.vlgmr.msra.gmra.mrb[12].mxu0 %vm573_vm4, %v625_v60  ;;  %1032 = vmatmul.mubr.msk.bf16.vlgmr.msra.gmra.mrb[12].mxu1 %vm573_vm4, %v676_v59 }
 0x1a2   : > { %1036 = vmatpush3.bf16.msra.mxu0 %v732_v58  ;;  %1037 = vmatprep.mubr.msk.bf16.mxu0 %vm1239_vm0, %v1238_v0 }
 0x1a4   : > { %v727_v61 = vpop.permute.xlu0 %726 }
 0x1a9   : > { %1038 = vmatmul.mubr.msk.bf16.vlgmr.msra.gmra.mrb[16].mxu0 %vm573_vm4, %v727_v61 }
 0x202   : > { %v615_v62 = vpop.f32.mrb[8].mxu1 }
 0x203   : > { %v1021_v63 = vpop.f32.mrb[9].mxu1 }
 0x204   : > { %v618_v2 = vpop.f32.mrb[10].mxu1 }
 0x205   : > { %v1022_v3 = vpop.f32.mrb[11].mxu1 }
 0x274   : > { %v666_v10 = vpop.f32.mrb[12].mxu0  ;;  %v717_v11 = vpop.f32.mrb[12].mxu1 }
 0x275   : > { %v672_v12 = vmax.f32 %v615_v62, %v666_v10  ;;  %v1027_v13 = vpop.f32.mrb[13].mxu0  ;;  %v1033_v14 = vpop.f32.mrb[13].mxu1 }
 0x276   : > { %v669_v15 = vpop.f32.mrb[14].mxu0  ;;  %v720_v16 = vpop.f32.mrb[14].mxu1 }
 0x277   : > { %v723_v17 = vmax.f32 %v672_v12, %v717_v11  ;;  %v1028_v18 = vpop.f32.mrb[15].mxu0  ;;  %v1034_v0 = vpop.f32.mrb[15].mxu1 }
 0x27c   : > { %v768_v19 = vpop.f32.mrb[16].mxu0 }
 0x27d   : > { %v774_v22 = vmax.f32 %v723_v17, %v768_v19  ;;  %v1039_v23 = vpop.f32.mrb[17].mxu0 }
 0x27e   : > { %v771_v24 = vpop.f32.mrb[18].mxu0 }
 0x27f   : > { %v785_v25 = vadd.f32 %v784_v21, %v774_v22  ;;  %v1040_v26 = vpop.f32.mrb[19].mxu0 }
 0x281   : > { %786 = vst.msk [vmem:[#allocation3] sm:$0xff] %vm573_vm4, %v785_v25  ;;  %v788_v27 = vsel %vm573_vm4, %v785_v25, -inf }
 0x282   : > { %789 = vmax.xlane.f32.xlu1 %v788_v27 }
 0x288   : > { %v816_v47 = vld [vmem:[#allocation3] sm:$0xff] }
 0x30f   : > { %v790_v29 = vpop.xlane.xlu1 %789 }
 0x310   : > { %v791_v30 = vmax.f32 %v787_v28, %v790_v29 }
 0x312   : > { %v793_v31 = vsub.f32 %v787_v28, %v791_v30  ;;  %810 = vst.msk [vmem:[#allocation4] sm:$0xff] %vm557_vm5, %v791_v30  ;;  %799 = vperm.xlu0 %1111, %v791_v30  }
 0x314   : > { %v794_v38 = vmul.f32 1.442695, %v793_v31 }
 0x319   : > { %v811_v32 = vld [vmem:[#allocation4] sm:$0xff] }
 0x31a   : > { %819 = vperm.xlu1 %1112, %v811_v32  }
 0x391   : > { %v800_v33 = vpop.permute.xlu0 %799 }
 0x392   : > { %v802_v34 = vsub.f32 %v785_v25, %v800_v33 }
 0x394   : > { %v803_v35 = vmul.f32 1.442695, %v802_v34 }
 0x396   : > { %1115 = vpow2.f32 %v803_v35 }
 0x397   : > { %1117 = vpow2.f32 %v794_v38 }
 0x399   : > { %v820_v46 = vpop.permute.xlu1 %819 }
 0x39a   : > { %v822_v48 = vsub.f32 %v816_v47, %v820_v46 }
 0x39c   : > { %v823_v49 = vmul.f32 1.442695, %v822_v48 }
 0x3a0   : > { %v1116_v36 = vpop.eup %1115 }
 0x3a1   : > { %v805_v37 = vsel %vm573_vm4, %v1116_v36, 0.0  ;;  %v1118_v39 = vpop.eup %1117 }
 0x3a2   : > { %806 = vadd.xlane.f32.xlu0 %v805_v37  ;;  %v796_v41 = vmul.f32 %v1118_v39, %v792_v40 }
 0x42f   : > { %v807_v42 = vpop.xlane.xlu0 %806 }
 0x430   : > { %v808_v43 = vadd.f32 %v807_v42, %v796_v41 }
 0x432   : > { %809 = vst.msk [vmem:[#allocation5] sm:$0xff] %vm557_vm5, %v808_v43 }
 0x439   : > { %v812_v44 = vld [vmem:[#allocation5] sm:$0xff] }
 0x43a   : > { %1119 = vrcp.f32 %v812_v44 }
 0x43b   : > { %1121 = vpow2.f32 %v823_v49 }
 0x444   : > { %v1120_v45 = vpop.eup %1119 }
 0x445   : > { %827 = vperm.xlu0 %1111, %v1120_v45   ;;  %v1122_v50 = vpop.eup %1121 }
 0x4c4   : > { %v828_v51 = vpop.permute.xlu0 %827 }
 0x4c5   : > { %v830_v52 = vmul.f32 %v1122_v50, %v828_v51 }
 0x4c7   : > { %832 = vst.msk [vmem:[%s253_s30] sm:$0xff] %vm573_vm4, %v830_v52 }
 0x4c8   : > { %1166 = shalt.err (!%p1163_p6)
}
 0x4c9   : > { %s1167_s25 = scalar_lea.hbm %s1492_s24, 128  ;;  %s1171_s15 = scalar_lea.hbm %s1547_s5, 256 }
 0x4ca   : > { %p1168_p4 = scmp.ne.s32.totalorder %s1492_s24, %s1167_s25  ;;  %p1172_p1 = scmp.lt.u32.totalorder %s1492_s24, %s1547_s5 }
 0x4cb   : > { %p1173_p2 = scmp.lt.u32.totalorder %s1171_s15, %s1167_s25  ;;  %p1175_p8 = scmp.lt.u32.totalorder %s1167_s25, %s1492_s24 }
 0x4cc   : > { %p1169_p10 = pnand %p1168_p4, %p1556_p9 }
 0x4cd   : > { %p1174_p5 = por %p1173_p2, %p1172_p1 }
 0x4ce   : > { %p1170_p12 = pneg %p1169_p10 }
 0x4cf   : > { %p1176_p11 = por %p1175_p8, %p1174_p5 }
 0x4d1   : > { %p1177_p0 = pnand %p1176_p11, %p1170_p12 }
 0x4d3   : > { %1180 = shalt.err (!%p1177_p0)
}
 0x4d4   : > { %1043 = dma.vmem_to_hbm [thread:$0]  (%p1556_p9), %s1494_s14, 128, %s1492_s24, %s839_s10  }
 0x4d5 PF: > { %s865_s30 = sand.u32 1, %s1215_s18   ;;  %p1557_p7 = scmp.ne.s32.totalorder %s1552_s8, 0 }
 0x4d6   : > { %p1558_p13 = scmp.ge.s32.totalorder %s1235_s23, 2  ;;  %s866_s16 = scalar_lea.sflag [#allocation8], %s865_s30 }
 0x4d8   : > { %p1050_p3 = pnand %p1558_p13, %p1557_p7 }
 0x4da   : > { %1210 = dma.done.wait (!%p1050_p3), %s866_s16, 128  }
 0x4db   : > { %1212 = vsyncadd (!%p1050_p3), %s866_s16, 4294967168  ;;  %s21_s23 = sadd.s32 1, %s1235_s23   ;;  %s1559_s18 = smov %s1219_s19 }
 0x4dc   : > { %p18_p6 = scmp.ge.s32.totalorder %s21_s23, 4   ;;  %s1560_s19 = smov %s1223_s20 }
 0x4dd   : > { %s1561_s20 = smov %s1333_s7  ;;  %s1562_s21 = smov %s1231_s22 }
 0x4de   : > { %s1563_s22 = smov %s1565_s26  ;;  %20 = sbr.rel (!%p18_p6) target bundleno = 6 (0x6), region = 114 }
 0x4e5   :  { %871 = vsyncpa [#allocation7], 1 }
 0x4e6   :  { %873 = vsyncpa [#allocation7 + $0x1], 1 }
 0x4e7   :  { %874 = vsyncpa [#allocation8], 1 }
 0x4e8   :  { %876 = vsyncpa [#allocation8 + $0x1], 1 }

</bundles_post_ra>
